<compile_context>
chip_gen: v6e
topology: v6e:2x2x1
jax: 0.10.0
libtpu: 0.0.40
codegen_flags: <defaults>
</compile_context>

<pallas_src>
import math
from functools import partial

import jax
import jax.numpy as jnp
from jax.experimental import pallas as pl
from jax.experimental.pallas import tpu as pltpu


_VMEM_LIMIT = 64 * 1024 * 1024


# ----------------------------------------------------------------------------
# Linear projection kernel:  y = x @ W + b   (W stored as (in, out))
# Tiled over rows (M) AND columns (N); bf16 operands, f32 accumulation.
# ----------------------------------------------------------------------------
def _linear_kernel(x_ref, w_ref, b_ref, o_ref):
    x = x_ref[...].astype(jnp.bfloat16)
    w = w_ref[...].astype(jnp.bfloat16)
    acc = jnp.dot(x, w, preferred_element_type=jnp.float32)
    o_ref[...] = (acc + b_ref[...].astype(jnp.float32)).astype(o_ref.dtype)


def _pick_tile(dim, tile, align):
    if dim <= tile:
        return dim                              # full dim == always legal
    return max(align, (tile // align) * align)  # aligned tile; ragged tail OK


def linear(x2d, w, b, *, tm=512, tn=1024):
    # x2d: (M, K), w: (K, N), b: (1, N)
    M, K = x2d.shape
    N = w.shape[1]
    tm = _pick_tile(M, tm, 8)
    tn = _pick_tile(N, tn, 128)
    grid = (pl.cdiv(M, tm), pl.cdiv(N, tn))

    itemsize = jnp.dtype(x2d.dtype).itemsize
    cost = pl.CostEstimate(
        flops=2 * M * K * N,
        transcendentals=0,
        bytes_accessed=(M * K + K * N + N + M * N) * itemsize,
    )
    return pl.pallas_call(
        _linear_kernel,
        out_shape=jax.ShapeDtypeStruct((M, N), x2d.dtype),
        grid=grid,
        in_specs=[
            pl.BlockSpec((tm, K), lambda i, j: (i, 0)),
            pl.BlockSpec((K, tn), lambda i, j: (0, j)),
            pl.BlockSpec((1, tn), lambda i, j: (0, j)),
        ],
        out_specs=pl.BlockSpec((tm, tn), lambda i, j: (i, j)),
        compiler_params=pltpu.CompilerParams(
            dimension_semantics=("parallel", "parallel"),
            vmem_limit_bytes=_VMEM_LIMIT,
        ),
        cost_estimate=cost,
    )(x2d, w, b)


# ----------------------------------------------------------------------------
# Fused QKV projection kernel: one pass over the activation, THREE outputs
# (no wrapper-side column-slice copies).  Requires nq == nk == nv.
# ----------------------------------------------------------------------------
def _qkv_kernel(x_ref, wq_ref, wk_ref, wv_ref, bq_ref, bk_ref, bv_ref,
                q_ref, k_ref, v_ref):
    x = x_ref[...].astype(jnp.bfloat16)
    for w_ref, b_ref, o_ref in ((wq_ref, bq_ref, q_ref),
                                (wk_ref, bk_ref, k_ref),
                                (wv_ref, bv_ref, v_ref)):
        acc = jnp.dot(x, w_ref[...].astype(jnp.bfloat16),
                      preferred_element_type=jnp.float32)
        o_ref[...] = (acc + b_ref[...].astype(jnp.float32)).astype(o_ref.dtype)


def fused_qkv(x2d, wq, bq, wk, bk, wv, bv, *, tm=512, tn=1024):
    M, K = x2d.shape
    N = wq.shape[1]
    assert wk.shape[1] == N and wv.shape[1] == N
    tm = _pick_tile(M, tm, 8)
    tn = _pick_tile(N, tn, 128)
    grid = (pl.cdiv(M, tm), pl.cdiv(N, tn))

    w_spec = pl.BlockSpec((K, tn), lambda i, j: (0, j))
    b_spec = pl.BlockSpec((1, tn), lambda i, j: (0, j))
    o_spec = pl.BlockSpec((tm, tn), lambda i, j: (i, j))
    out_sd = jax.ShapeDtypeStruct((M, N), x2d.dtype)

    itemsize = jnp.dtype(x2d.dtype).itemsize
    cost = pl.CostEstimate(
        flops=3 * 2 * M * K * N,
        transcendentals=0,
        bytes_accessed=(M * K + 3 * K * N + 3 * N + 3 * M * N) * itemsize,
    )
    return pl.pallas_call(
        _qkv_kernel,
        out_shape=(out_sd, out_sd, out_sd),
        grid=grid,
        in_specs=[
            pl.BlockSpec((tm, K), lambda i, j: (i, 0)),
            w_spec, w_spec, w_spec,
            b_spec, b_spec, b_spec,
        ],
        out_specs=(o_spec, o_spec, o_spec),
        compiler_params=pltpu.CompilerParams(
            dimension_semantics=("parallel", "parallel"),
            vmem_limit_bytes=_VMEM_LIMIT,
        ),
        cost_estimate=cost,
    )(x2d, wq, wk, wv, bq, bk, bv)


# ----------------------------------------------------------------------------
# Masked full attention kernel: one (batch, L-tile) per grid step, all heads
# processed per step (static unroll).
# q: (B, L, H*dqk), k: (B, S, H*dqk), v: (B, S, H*dv), mask: (1|B, L, S) int8
# outputs: context (B, L, H*dv) and (optionally) attn weights (B, H, L, S).
# ----------------------------------------------------------------------------
def _attn_kernel(*refs, scale, n_heads, d_qk, d_v, has_mask, return_attn):
    q_ref, k_ref, v_ref = refs[0], refs[1], refs[2]
    nxt = 3
    if has_mask:
        m_ref = refs[nxt]
        nxt += 1
    o_ref = refs[nxt]
    nxt += 1
    a_ref = refs[nxt] if return_attn else None

    q = q_ref[0].astype(jnp.bfloat16)      # (tl, H*d_qk) -> bf16 MXU operands
    k = k_ref[0].astype(jnp.bfloat16)      # (S,  H*d_qk)
    v = v_ref[0].astype(jnp.bfloat16)      # (S,  H*d_v)
    if has_mask:
        # Additive bias built once per grid step (not H x jnp.where).
        bias = m_ref[0].astype(jnp.float32) * jnp.float32(-1e9)   # (tl, S)

    for h in range(n_heads):               # static unroll over heads
        qh = q[:, h * d_qk:(h + 1) * d_qk]          # contiguous lane slices
        kh = k[:, h * d_qk:(h + 1) * d_qk]
        vh = v[:, h * d_v:(h + 1) * d_v]
        # Contract the feature axis of BOTH operands directly (no k.T relayout).
        s = jax.lax.dot_general(
            qh, kh, (((1,), (1,)), ((), ())),
            preferred_element_type=jnp.float32) * jnp.float32(scale)
        if has_mask:
            s = s + bias
        mx = jnp.max(s, axis=-1, keepdims=True)
        p = jnp.exp(s - mx)
        denom = jnp.sum(p, axis=-1, keepdims=True)
        if return_attn:
            a = p / denom                            # exact: weights sum to 1
            a_ref[0, h] = a.astype(a_ref.dtype)
        else:
            a = p * pl.reciprocal(denom, approx=True)   # EUP slot, ~free
        ctx = jnp.dot(a.astype(jnp.bfloat16), vh,
                      preferred_element_type=jnp.float32)
        # Per-head direct store -> no concat, bounded live ranges.
        o_ref[0, :, h * d_v:(h + 1) * d_v] = ctx.astype(o_ref.dtype)


def masked_attention(q, k, v, mask, scale, n_heads, *, return_attn=True,
                     tl=256):
    B, L, HE = q.shape
    _, S, HD = v.shape
    H = n_heads
    d_qk = HE // H
    d_v = HD // H
    has_mask = mask is not None

    tl = _pick_tile(L, tl, 8)
    gl = pl.cdiv(L, tl)

    kernel = partial(_attn_kernel, scale=scale, n_heads=H, d_qk=d_qk, d_v=d_v,
                     has_mask=has_mask, return_attn=return_attn)

    in_specs = [
        pl.BlockSpec((1, tl, HE), lambda b, l: (b, l, 0)),
        pl.BlockSpec((1, S, HE), lambda b, l: (b, 0, 0)),
        pl.BlockSpec((1, S, HD), lambda b, l: (b, 0, 0)),
    ]
    args = [q, k, v]
    mask_bytes = 0
    if has_mask:
        Bm = mask.shape[0]
        mask_map = (lambda b, l: (b, l, 0)) if Bm > 1 else (lambda b, l: (0, l, 0))
        in_specs.append(pl.BlockSpec((1, tl, S), mask_map))
        args.append(mask)
        mask_bytes = mask.size * jnp.dtype(mask.dtype).itemsize

    o_shape = jax.ShapeDtypeStruct((B, L, HD), q.dtype)
    o_spec = pl.BlockSpec((1, tl, HD), lambda b, l: (b, l, 0))

    itemsize = jnp.dtype(q.dtype).itemsize
    cost = pl.CostEstimate(
        flops=2 * B * H * L * S * (d_qk + d_v) + 6 * B * H * L * S,
        transcendentals=B * H * L * S + B * H * L,
        bytes_accessed=((q.size + k.size + v.size) * itemsize + mask_bytes
                        + B * L * HD * itemsize
                        + (B * H * L * S * 4 if return_attn else 0)),
    )
    cparams = pltpu.CompilerParams(
        dimension_semantics=("parallel", "parallel"),   # B and L-tiles over TCs
        vmem_limit_bytes=_VMEM_LIMIT,
    )

    if return_attn:
        out, attn = pl.pallas_call(
            kernel,
            out_shape=(o_shape, jax.ShapeDtypeStruct((B, H, L, S), jnp.float32)),
            grid=(B, gl),
            in_specs=in_specs,
            out_specs=(o_spec,
                       pl.BlockSpec((1, H, tl, S), lambda b, l: (b, 0, l, 0))),
            compiler_params=cparams,
            cost_estimate=cost,
        )(*args)
        return out, attn

    out = pl.pallas_call(
        kernel,
        out_shape=o_shape,
        grid=(B, gl),
        in_specs=in_specs,
        out_specs=o_spec,
        compiler_params=cparams,
        cost_estimate=cost,
    )(*args)
    return out, None


# ----------------------------------------------------------------------------
# Mask normalization (accepts PyTorch-style masks; nonzero/True = masked out).
# Never broadcast to (B*H, L, S): returned as (1|B, L, S) int8.
# ----------------------------------------------------------------------------
def _normalize_mask(attn_mask, B, L, S):
    if attn_mask is None:
        return None
    m = jnp.asarray(attn_mask)
    if m.ndim == 2:            # (L, S)
        m = m[None]
    elif m.ndim == 4:          # (B|1, 1, L, S)  (TriangularCausalMask convention)
        m = m[:, 0]
    elif m.ndim != 3:          # (B|1, L, S)
        raise ValueError(f"unsupported attn_mask rank: {m.shape}")
    if m.shape[1:] != (L, S) or m.shape[0] not in (1, B):
        raise ValueError(f"attn_mask shape {m.shape} incompatible with "
                         f"(B={B}, L={L}, S={S})")
    return m.astype(jnp.int8)


# ----------------------------------------------------------------------------
# Parameter init (matches nn.Linear default uniform(-1/sqrt(fan_in), +))
# ----------------------------------------------------------------------------
def init_attention_layer(key, d_model, n_heads, d_keys=None, d_values=None):
    d_keys = d_keys or d_model // n_heads
    d_values = d_values or d_model // n_heads

    def lin(k, fan_in, fan_out):
        kw, kb = jax.random.split(k)
        bound = 1.0 / math.sqrt(fan_in)
        w = jax.random.uniform(kw, (fan_in, fan_out), jnp.float32, -bound, bound)
        b = jax.random.uniform(kb, (1, fan_out), jnp.float32, -bound, bound)
        return w, b

    k1, k2, k3, k4 = jax.random.split(key, 4)
    return {
        "n_heads": n_heads,
        "q": lin(k1, d_model, d_keys * n_heads),
        "k": lin(k2, d_model, d_keys * n_heads),
        "v": lin(k3, d_model, d_values * n_heads),
        "o": lin(k4, d_values * n_heads, d_model),
    }


# ----------------------------------------------------------------------------
# Full forward pass (mirrors AttentionLayer.forward)
# ----------------------------------------------------------------------------
def attention_layer_forward(params, queries, keys, values, attn_mask=None,
                            tau=None, delta=None, *, return_attn=True):
    del tau, delta  # accepted for API parity; FullAttention ignores them
    B, L, d_model = queries.shape
    _, S, _ = keys.shape
    H = params["n_heads"]
    wq, bq = params["q"]
    wk, bk = params["k"]
    wv, bv = params["v"]
    nq, nk, nv = wq.shape[1], wk.shape[1], wv.shape[1]

    if (queries is keys) and (keys is values) and (nq == nk == nv):
        # Self-attention: fused QKV projection, one activation pass, 3 outputs
        # written straight from the kernel (no wrapper slice copies).
        q2d, k2d, v2d = fused_qkv(queries.reshape(B * L, d_model),
                                  wq, bq, wk, bk, wv, bv)
    else:
        q2d = linear(queries.reshape(B * L, d_model), wq, bq)
        k2d = linear(keys.reshape(B * S, d_model), wk, bk)
        v2d = linear(values.reshape(B * S, d_model), wv, bv)

    # Keep the projection layout (B, seq, H*head_dim) -> no HBM transposes.
    q3 = q2d.reshape(B, L, nq)
    k3 = k2d.reshape(B, S, nk)
    v3 = v2d.reshape(B, S, nv)

    mask = _normalize_mask(attn_mask, B, L, S)
    scale = 1.0 / math.sqrt(nq // H)

    out3, attn = masked_attention(q3, k3, v3, mask, scale, H,
                                  return_attn=return_attn)   # (B,L,H*dv), (B,H,L,S)

    wo, bo = params["o"]
    out = linear(out3.reshape(B * L, nv), wo, bo).reshape(B, L, d_model)
    return out, attn


# ----------------------------------------------------------------------------
# Pure-JAX reference (for a correctness sanity check)
# ----------------------------------------------------------------------------
def _reference_forward(params, queries, keys, values, attn_mask):
    B, L, d_model = queries.shape
    _, S, _ = keys.shape
    H = params["n_heads"]
    q = (queries @ params["q"][0] + params["q"][1]).reshape(B, L, H, -1)
    k = (keys @ params["k"][0] + params["k"][1]).reshape(B, S, H, -1)
    v = (values @ params["v"][0] + params["v"][1]).reshape(B, S, H, -1)
    E = q.shape[-1]
    scores = jnp.einsum("blhe,bshe->bhls", q, k) / math.sqrt(E)
    if attn_mask is not None:
        m = _normalize_mask(attn_mask, B, L, S)          # (1|B, L, S)
        scores = jnp.where(m[:, None, :, :] != 0, -1e9, scores)
    a = jax.nn.softmax(scores, axis=-1)
    o = jnp.einsum("bhls,bshd->blhd", a, v).reshape(B, L, -1)
    return o @ params["o"][0] + params["o"][1], a


if __name__ == "__main__":
    B, L, S, d_model, n_heads = 2, 8, 8, 32, 4

    key = jax.random.PRNGKey(0)
    kp, kx, kq, kk, kv = jax.random.split(key, 5)
    params = init_attention_layer(kp, d_model, n_heads)

    # Tolerances account for bf16 MXU operands (f32 accumulation).
    ATOL = RTOL = 2e-2

    # --- 1) self-attention (exercises the fused QKV projection) + causal mask
    x = jax.random.normal(kx, (B, L, d_model), jnp.float32)
    causal = jnp.triu(jnp.ones((L, S), dtype=jnp.int8), k=1)   # 1 = masked out
    out, attn = attention_layer_forward(params, x, x, x, causal)
    out = jax.block_until_ready(out)
    attn = jax.block_until_ready(attn)
    out_ref, attn_ref = _reference_forward(params, x, x, x, causal)
    assert out.shape == (B, L, d_model) and attn.shape == (B, n_heads, L, S)
    assert jnp.allclose(out, out_ref, atol=ATOL, rtol=RTOL)
    assert jnp.allclose(attn, attn_ref, atol=ATOL, rtol=RTOL)

    # --- 2) cross-attention (separate projections), no mask
    queries = jax.random.normal(kq, (B, L, d_model), jnp.float32)
    keys_ = jax.random.normal(kk, (B, S, d_model), jnp.float32)
    values_ = jax.random.normal(kv, (B, S, d_model), jnp.float32)
    out2, attn2 = attention_layer_forward(params, queries, keys_, values_, None)
    out2 = jax.block_until_ready(out2)
    attn2 = jax.block_until_ready(attn2)
    out2_ref, attn2_ref = _reference_forward(params, queries, keys_, values_, None)
    assert jnp.allclose(out2, out2_ref, atol=ATOL, rtol=RTOL)
    assert jnp.allclose(attn2, attn2_ref, atol=ATOL, rtol=RTOL)

    # --- 3) production path: no attention-weights writeback (approx reciprocal)
    out3, attn3 = attention_layer_forward(params, x, x, x, causal,
                                          return_attn=False)
    out3 = jax.block_until_ready(out3)
    assert attn3 is None
    assert jnp.allclose(out3, out_ref, atol=ATOL, rtol=RTOL)

    print("KERNEL_OK")
</pallas_src>

<mosaic_0001>
module attributes {stable_mosaic.version = 11 : i64} {
  func.func @_qkv_kernel(%arg0: i32, %arg1: i32, %arg2: memref<16x32xf32, #tpu.memory_space<vmem>>, %arg3: memref<32x32xf32, #tpu.memory_space<vmem>>, %arg4: memref<32x32xf32, #tpu.memory_space<vmem>>, %arg5: memref<32x32xf32, #tpu.memory_space<vmem>>, %arg6: memref<1x32xf32, #tpu.memory_space<vmem>>, %arg7: memref<1x32xf32, #tpu.memory_space<vmem>>, %arg8: memref<1x32xf32, #tpu.memory_space<vmem>>, %arg9: memref<16x32xf32, #tpu.memory_space<vmem>>, %arg10: memref<16x32xf32, #tpu.memory_space<vmem>>, %arg11: memref<16x32xf32, #tpu.memory_space<vmem>>) attributes {dimension_semantics = [#tpu.dimension_semantics<parallel>, #tpu.dimension_semantics<parallel>], iteration_bounds = array<i64: 1, 1>, scalar_prefetch = 0 : i64, scratch_operands = 0 : i64, tpu.core_type = #tpu.core_type<tc>, window_params = [{transform_indices = @transform_0, window_bounds = array<i64: 16, 32>}, {transform_indices = @transform_1, window_bounds = array<i64: 32, 32>}, {transform_indices = @transform_2, window_bounds = array<i64: 32, 32>}, {transform_indices = @transform_3, window_bounds = array<i64: 32, 32>}, {transform_indices = @transform_4, window_bounds = array<i64: 1, 32>}, {transform_indices = @transform_5, window_bounds = array<i64: 1, 32>}, {transform_indices = @transform_6, window_bounds = array<i64: 1, 32>}, {transform_indices = @transform_7, window_bounds = array<i64: 16, 32>}, {transform_indices = @transform_8, window_bounds = array<i64: 16, 32>}, {transform_indices = @transform_9, window_bounds = array<i64: 16, 32>}]} {
    %c0 = arith.constant 0 : index
    %c0_0 = arith.constant 0 : index
    %0 = vector.load %arg2[%c0, %c0_0] : memref<16x32xf32, #tpu.memory_space<vmem>>, vector<16x32xf32>
    %1 = arith.truncf %0 : vector<16x32xf32> to vector<16x32xbf16>
    %c0_1 = arith.constant 0 : index
    %c0_2 = arith.constant 0 : index
    %2 = vector.load %arg3[%c0_1, %c0_2] : memref<32x32xf32, #tpu.memory_space<vmem>>, vector<32x32xf32>
    %3 = arith.truncf %2 : vector<32x32xf32> to vector<32x32xbf16>
    %cst = arith.constant dense<0.000000e+00> : vector<16x32xf32>
    %4 = tpu.matmul %1, %3, %cst {dimension_numbers = #tpu.dot_dimension_numbers<[1], [0], [0], [1], [0, 0, 1, 1], [], []>} : vector<16x32xbf16>, vector<32x32xbf16>, vector<16x32xf32> -> vector<16x32xf32>
    %c0_3 = arith.constant 0 : index
    %c0_4 = arith.constant 0 : index
    %5 = vector.load %arg6[%c0_3, %c0_4] : memref<1x32xf32, #tpu.memory_space<vmem>>, vector<1x32xf32>
    %6 = vector.broadcast %5 : vector<1x32xf32> to vector<16x32xf32>
    %7 = arith.addf %4, %6 : vector<16x32xf32>
    %c0_5 = arith.constant 0 : index
    %c0_6 = arith.constant 0 : index
    %8 = vector.load %arg9[%c0_5, %c0_6] : memref<16x32xf32, #tpu.memory_space<vmem>>, vector<16x32xf32>
    tpu.vector_store %arg9[%c0_5, %c0_6], %7 {strides = array<i32>} : memref<16x32xf32, #tpu.memory_space<vmem>>, vector<16x32xf32>,
    %c0_7 = arith.constant 0 : index
    %c0_8 = arith.constant 0 : index
    %9 = vector.load %arg4[%c0_7, %c0_8] : memref<32x32xf32, #tpu.memory_space<vmem>>, vector<32x32xf32>
    %10 = arith.truncf %9 : vector<32x32xf32> to vector<32x32xbf16>
    %cst_9 = arith.constant dense<0.000000e+00> : vector<16x32xf32>
    %11 = tpu.matmul %1, %10, %cst_9 {dimension_numbers = #tpu.dot_dimension_numbers<[1], [0], [0], [1], [0, 0, 1, 1], [], []>} : vector<16x32xbf16>, vector<32x32xbf16>, vector<16x32xf32> -> vector<16x32xf32>
    %c0_10 = arith.constant 0 : index
    %c0_11 = arith.constant 0 : index
    %12 = vector.load %arg7[%c0_10, %c0_11] : memref<1x32xf32, #tpu.memory_space<vmem>>, vector<1x32xf32>
    %13 = vector.broadcast %12 : vector<1x32xf32> to vector<16x32xf32>
    %14 = arith.addf %11, %13 : vector<16x32xf32>
    %c0_12 = arith.constant 0 : index
    %c0_13 = arith.constant 0 : index
    %15 = vector.load %arg10[%c0_12, %c0_13] : memref<16x32xf32, #tpu.memory_space<vmem>>, vector<16x32xf32>
    tpu.vector_store %arg10[%c0_12, %c0_13], %14 {strides = array<i32>} : memref<16x32xf32, #tpu.memory_space<vmem>>, vector<16x32xf32>,
    %c0_14 = arith.constant 0 : index
    %c0_15 = arith.constant 0 : index
    %16 = vector.load %arg5[%c0_14, %c0_15] : memref<32x32xf32, #tpu.memory_space<vmem>>, vector<32x32xf32>
    %17 = arith.truncf %16 : vector<32x32xf32> to vector<32x32xbf16>
    %cst_16 = arith.constant dense<0.000000e+00> : vector<16x32xf32>
    %18 = tpu.matmul %1, %17, %cst_16 {dimension_numbers = #tpu.dot_dimension_numbers<[1], [0], [0], [1], [0, 0, 1, 1], [], []>} : vector<16x32xbf16>, vector<32x32xbf16>, vector<16x32xf32> -> vector<16x32xf32>
    %c0_17 = arith.constant 0 : index
    %c0_18 = arith.constant 0 : index
    %19 = vector.load %arg8[%c0_17, %c0_18] : memref<1x32xf32, #tpu.memory_space<vmem>>, vector<1x32xf32>
    %20 = vector.broadcast %19 : vector<1x32xf32> to vector<16x32xf32>
    %21 = arith.addf %18, %20 : vector<16x32xf32>
    %c0_19 = arith.constant 0 : index
    %c0_20 = arith.constant 0 : index
    %22 = vector.load %arg11[%c0_19, %c0_20] : memref<16x32xf32, #tpu.memory_space<vmem>>, vector<16x32xf32>
    tpu.vector_store %arg11[%c0_19, %c0_20], %21 {strides = array<i32>} : memref<16x32xf32, #tpu.memory_space<vmem>>, vector<16x32xf32>,
    return
  }
  func.func @transform_0(%arg0: i32, %arg1: i32) -> (i32, i32) {
    %c0_i32 = arith.constant 0 : i32
    %c0_i32_0 = arith.constant 0 : i32
    return %arg0, %c0_i32 : i32, i32
  }
  func.func @transform_1(%arg0: i32, %arg1: i32) -> (i32, i32) {
    %c0_i32 = arith.constant 0 : i32
    %c0_i32_0 = arith.constant 0 : i32
    return %c0_i32, %arg1 : i32, i32
  }
  func.func @transform_2(%arg0: i32, %arg1: i32) -> (i32, i32) {
    %c0_i32 = arith.constant 0 : i32
    %c0_i32_0 = arith.constant 0 : i32
    return %c0_i32, %arg1 : i32, i32
  }
  func.func @transform_3(%arg0: i32, %arg1: i32) -> (i32, i32) {
    %c0_i32 = arith.constant 0 : i32
    %c0_i32_0 = arith.constant 0 : i32
    return %c0_i32, %arg1 : i32, i32
  }
  func.func @transform_4(%arg0: i32, %arg1: i32) -> (i32, i32) {
    %c0_i32 = arith.constant 0 : i32
    %c0_i32_0 = arith.constant 0 : i32
    return %c0_i32, %arg1 : i32, i32
  }
  func.func @transform_5(%arg0: i32, %arg1: i32) -> (i32, i32) {
    %c0_i32 = arith.constant 0 : i32
    %c0_i32_0 = arith.constant 0 : i32
    return %c0_i32, %arg1 : i32, i32
  }
  func.func @transform_6(%arg0: i32, %arg1: i32) -> (i32, i32) {
    %c0_i32 = arith.constant 0 : i32
    %c0_i32_0 = arith.constant 0 : i32
    return %c0_i32, %arg1 : i32, i32
  }
  func.func @transform_7(%arg0: i32, %arg1: i32) -> (i32, i32) {
    %c0_i32 = arith.constant 0 : i32
    return %arg0, %arg1 : i32, i32
  }
  func.func @transform_8(%arg0: i32, %arg1: i32) -> (i32, i32) {
    %c0_i32 = arith.constant 0 : i32
    return %arg0, %arg1 : i32, i32
  }
  func.func @transform_9(%arg0: i32, %arg1: i32) -> (i32, i32) {
    %c0_i32 = arith.constant 0 : i32
    return %arg0, %arg1 : i32, i32
  }
}

</mosaic_0001>

<bundles_post_ra>
// kernel: tpu_custom_call.1
= control target key start
LH: loop header
LB: loop body
LE: loop exit
PB: predicated region body
PF: predicated region fallthrough
CT: control target
= control target key end

     0   :  { %15 = vsyncpa [#allocation3], 0  ;;  %s636_s0 = inlined_call_operand.hbm [shape: f32[16,32], index: 0, kind: input, shape index: {}]   ;;  %s637_s1 = inlined_call_operand.hbm [shape: f32[32,32], index: 1, kind: input, shape index: {}]   ;;  %s638_s2 = inlined_call_operand.hbm [shape: f32[32,32], index: 2, kind: input, shape index: {}]   ;;  %s639_s3 = inlined_call_operand.hbm [shape: f32[32,32], index: 3, kind: input, shape index: {}]   ;;  %s640_s4 = inlined_call_operand.vmem [shape: f32[1,32], index: 4, kind: input, shape index: {}]   ;;  %s641_s5 = inlined_call_operand.vmem [shape: f32[1,32], index: 5, kind: input, shape index: {}]   ;;  %s642_s6 = inlined_call_operand.vmem [shape: f32[1,32], index: 6, kind: input, shape index: {}]   ;;  %s643_s7 = inlined_call_operand.hbm [shape: f32[16,32], index: 7, kind: output, shape index: {0}]   ;;  %s644_s8 = inlined_call_operand.hbm [shape: f32[16,32], index: 8, kind: output, shape index: {1}]   ;;  %s645_s9 = inlined_call_operand.hbm [shape: f32[16,32], index: 9, kind: output, shape index: {2}]  }
   0x1   :  { %16 = vsyncpa [#allocation6], 0 }
   0x2   :  { %17 = vsyncpa [#allocation9], 0 }
   0x3   :  { %18 = vsyncpa [#allocation4], 0 }
   0x4   :  { %19 = vsyncpa [#allocation12], 0  ;;  %s512_s30 = smov [#allocation5]   ;;  %s513_s11 = smov [#allocation2]  }
   0x5   :  { %s37_s10 = sshll.u32 %s512_s30, 4  ;;  %s25_s12 = sshll.u32 %s513_s11, 4  ;;  %s38_s10 = int_to_ptr.vmem [resolvable:$true] %s37_s10  ;;  %s26_s12 = int_to_ptr.vmem [resolvable:$true] %s25_s12 }
   0x6   :  { %s370_s13 = scalar_lea.vmem %s38_s10, 512  ;;  %p375_p1 = scmp.lt.s32.totalorder %s38_s10, %s38_s10 }
   0x7   :  { %p371_p0 = scmp.ne.s32.totalorder %s38_s10, %s370_s13  ;;  %p376_p2 = scmp.lt.s32.totalorder %s370_s13, %s370_s13 }
   0x9   :  { %p377_p3 = por %p376_p2, %p375_p1 }
   0xb   :  { %p378_p4 = pnand %p377_p3, %p371_p0 }
   0xd   :  { %381 = shalt.err (!%p378_p4)
}
   0xe   :  { %s514_s14 = smov 128   ;;  %s515_s15 = smov 8  }
   0xf   :  { %43 = dma.hbm_to_vmem [thread:$0]  %s637_s1, 512, %s38_s10, [#allocation6], %s514_s14, %s514_s14, %s515_s15  }
  0x10   :  { %s390_s18 = scalar_lea.vmem %s26_s12, 256  ;;  %p395_p6 = scmp.lt.s32.totalorder %s26_s12, %s26_s12 }
  0x11   :  { %p391_p5 = scmp.ne.s32.totalorder %s26_s12, %s390_s18  ;;  %p396_p7 = scmp.lt.s32.totalorder %s390_s18, %s390_s18 }
  0x13   :  { %p397_p8 = por %p396_p7, %p395_p6 }
  0x15   :  { %p398_p9 = pnand %p397_p8, %p391_p5 }
  0x17   :  { %401 = shalt.err (!%p398_p9)
}
  0x18   :  { %31 = dma.hbm_to_vmem [thread:$0]  %s636_s0, 256, %s26_s12, [#allocation3], %s514_s14, %s514_s14, %s515_s15  }
  0x19   :  { %s516_s21 = smov [#allocation7]   ;;  %s517_s23 = smov [#allocation8]  }
  0x1a   :  { %s49_s22 = sshll.u32 %s516_s21, 4  ;;  %s61_s24 = sshll.u32 %s517_s23, 4  ;;  %s50_s22 = int_to_ptr.vmem [resolvable:$true] %s49_s22  ;;  %s62_s24 = int_to_ptr.vmem [resolvable:$true] %s61_s24 }
  0x1b   :  { %s410_s1 = scalar_lea.vmem %s50_s22, 512  ;;  %p415_p11 = scmp.lt.s32.totalorder %s50_s22, %s50_s22 }
  0x1c   :  { %p411_p10 = scmp.ne.s32.totalorder %s50_s22, %s410_s1  ;;  %p416_p12 = scmp.lt.s32.totalorder %s410_s1, %s410_s1 }
  0x1e   :  { %p417_p13 = por %p416_p12, %p415_p11 }
  0x20   :  { %p418_p0 = pnand %p417_p13, %p411_p10 }
  0x22   :  { %421 = shalt.err (!%p418_p0)
}
  0x23   :  { %55 = dma.hbm_to_vmem [thread:$0]  %s638_s2, 512, %s50_s22, [#allocation6], %s514_s14, %s514_s14, %s515_s15  }
  0x24   :  { %s430_s0 = scalar_lea.vmem %s62_s24, 512  ;;  %p435_p2 = scmp.lt.s32.totalorder %s62_s24, %s62_s24 }
  0x25   :  { %p431_p1 = scmp.ne.s32.totalorder %s62_s24, %s430_s0  ;;  %p436_p3 = scmp.lt.s32.totalorder %s430_s0, %s430_s0 }
  0x27   :  { %p437_p4 = por %p436_p3, %p435_p2 }
  0x29   :  { %p438_p5 = pnand %p437_p4, %p431_p1 }
  0x2b   :  { %441 = shalt.err (!%p438_p5)
}
  0x2c   :  { %67 = dma.hbm_to_vmem [thread:$0]  %s639_s3, 512, %s62_s24, [#allocation9], %s514_s14, %s514_s14, %s515_s15  }
  0x2d   :  { %502 = dma.done.wait [#allocation3], 256  }
  0x2e   :  { %503 = vsyncadd [#allocation3], 4294967040 }
  0x2f   :  { %504 = dma.done.wait [#allocation6], 1024  }
  0x30   :  { %505 = vsyncadd [#allocation6], 4294966272 }
  0x31   :  { %506 = dma.done.wait [#allocation9], 512  }
  0x32   :  { %507 = vsyncadd [#allocation9], 4294966784  ;;  %v518_v0 = vmov 0.0   ;;  %vm519_vm0 = vmmov 0   ;;  %v92_v1 = vld [vmem:[#allocation5 + $0x10] sm:$0xff]  ;;  %v93_v2 = vld [vmem:[#allocation5 + $0x18] sm:$0xff] }
  0x33   :  { %327 = vmatprep.subr.bf16.mxu0 %v518_v0  ;;  %335 = vmatprep.subr.bf16.mxu1 %v518_v0  ;;  %v152_v3 = vld [vmem:[#allocation7 + $0x10] sm:$0xff]  ;;  %v95_v4 = vpack.c.bf16 %v93_v2, %v92_v1  ;;  %v153_v5 = vld [vmem:[#allocation7 + $0x18] sm:$0xff]  ;;  %v90_v6 = vld [vmem:[#allocation5] sm:$0xff]  ;;  %vm103_vm1 = vcmask 261120   ;;  %s520_s10 = smov [#allocation10]   ;;  %s521_s12 = smov [#allocation11]  }
  0x34   :  { %331 = vmatprep.mubr.msk.bf16.mxu0 %vm519_vm0, %v518_v0  ;;  %339 = vmatprep.mubr.msk.bf16.mxu1 %vm519_vm0, %v518_v0  ;;  %v91_v7 = vld [vmem:[#allocation5 + $0x8] sm:$0xff]  ;;  %v155_v8 = vpack.c.bf16 %v153_v5, %v152_v3  ;;  %v150_v9 = vld [vmem:[#allocation7] sm:$0xff]  ;;  %v87_v12 = vld [vmem:[#allocation2] sm:$0xff]  ;;  %s267_s11 = sshll.u32 %s520_s10, 4  ;;  %s279_s13 = sshll.u32 %s521_s12, 4  ;;  %s268_s11 = int_to_ptr.vmem [resolvable:$true] %s267_s11  ;;  %s280_s13 = int_to_ptr.vmem [resolvable:$true] %s279_s13 }
  0x35   :  { %v151_v10 = vld [vmem:[#allocation7 + $0x8] sm:$0xff]  ;;  %328 = vmatpush3.bf16.msra.mxu0 %v95_v4  ;;  %v94_v11 = vpack.c.bf16 %v91_v7, %v90_v6  ;;  %v88_v13 = vld [vmem:[#allocation2 + $0x8] sm:$0xff]  ;;  %v208_v15 = vld [vmem:[#allocation8 + $0x10] sm:$0xff]  ;;  %s442_s16 = scalar_lea.vmem %s268_s11, 256  ;;  %p447_p7 = scmp.lt.s32.totalorder %s268_s11, %s268_s11 }
  0x36   :  { %336 = vmatpush3.bf16.msra.mxu1 %v155_v8  ;;  %329 = vmatprep.subr.bf16.mxu0 %v518_v0  ;;  %v154_v14 = vpack.c.bf16 %v151_v10, %v150_v9  ;;  %v209_v16 = vld [vmem:[#allocation8 + $0x18] sm:$0xff]  ;;  %v89_v17 = vpack.c.bf16 %v88_v13, %v87_v12  ;;  %v206_v19 = vld [vmem:[#allocation8] sm:$0xff]  ;;  %v207_v20 = vld [vmem:[#allocation8 + $0x8] sm:$0xff]  ;;  %p443_p6 = scmp.ne.s32.totalorder %s268_s11, %s442_s16  ;;  %p448_p8 = scmp.lt.s32.totalorder %s442_s16, %s442_s16 }
  0x37   :  { %337 = vmatprep.subr.bf16.mxu1 %v518_v0  ;;  %v211_v18 = vpack.c.bf16 %v209_v16, %v208_v15  ;;  %v210_v21 = vpack.c.bf16 %v207_v20, %v206_v19  ;;  %v312_v22 = vld [vmem:[%s640_s4] ss:$0 sm:$0xff] }
  0x38   :  { %v314_v23 = vld [vmem:[%s641_s5] ss:$0 sm:$0xff]  ;;  %p449_p9 = por %p448_p8, %p447_p7 }
  0x39   :  { %330 = vmatpush3.bf16.msra.mxu0 %v94_v11  ;;  %v316_v35 = vld [vmem:[%s642_s6] ss:$0 sm:$0xff] }
  0x3a   :  { %338 = vmatpush3.bf16.msra.mxu1 %v154_v14  ;;  %343 = vmatprep.subr.bf16.mxu0 %v518_v0  ;;  %p450_p10 = pnand %p449_p9, %p443_p6 }
  0x3c   :  { %332 = vmatmul.mubr.msk.bf16.vlgmr.msra.gmra.mxu0 %vm103_vm1, %v89_v17 }
  0x3d   :  { %344 = vmatpush3.bf16.msra.mxu0 %v211_v18  ;;  %340 = vmatmul.mubr.msk.bf16.vlgmr.msra.gmra.mxu1 %vm103_vm1, %v89_v17 }
  0x3e   :  { %345 = vmatprep.subr.bf16.mxu0 %v518_v0  ;;  %347 = vmatprep.mubr.msk.bf16.mxu0 %vm519_vm0, %v518_v0 }
  0x41   :  { %346 = vmatpush3.bf16.msra.mxu0 %v210_v21 }
  0x44   :  { %348 = vmatmul.mubr.msk.bf16.vlgmr.msra.gmra.mxu0 %vm103_vm1, %v89_v17 }
  0xfc   :  { %v141_v24 = vpop.f32.mrf.mxu0 }
  0xfd   :  { %v142_v25 = vadd.f32 %v312_v22, %v141_v24  ;;  %v197_v26 = vpop.f32.mrf.mxu1 }
  0xfe   :  { %v333_v27 = vpop.f32.mrf.mxu0  ;;  %v198_v28 = vadd.f32 %v314_v23, %v197_v26 }
  0xff   :  { %148 = vst.msk [vmem:[#allocation10] sm:$0xff] %vm103_vm1, %v142_v25  ;;  %v341_v29 = vpop.f32.mrf.mxu1 }
 0x100   :  { %204 = vst.msk [vmem:[#allocation11] sm:$0xff] %vm103_vm1, %v198_v28  ;;  %v144_v30 = vpop.f32.mrf.mxu0 }
 0x101   :  { %v145_v31 = vadd.f32 %v312_v22, %v144_v30  ;;  %v200_v32 = vpop.f32.mrf.mxu1 }
 0x102   :  { %v334_v33 = vpop.f32.mrf.mxu0  ;;  %v201_v34 = vadd.f32 %v314_v23, %v200_v32 }
 0x103   :  { %149 = vst.msk [vmem:[#allocation10 + $0x8] sm:$0xff] %vm103_vm1, %v145_v31  ;;  %v342_v36 = vpop.f32.mrf.mxu1 }
 0x104   :  { %205 = vst.msk [vmem:[#allocation11 + $0x8] sm:$0xff] %vm103_vm1, %v201_v34  ;;  %v253_v37 = vpop.f32.mrf.mxu0 }
 0x105   :  { %453 = shalt.err (!%p450_p10)
}
 0x106   :  { %273 = dma.vmem_to_hbm [thread:$0]  %s268_s11, 256, %s643_s7, [#allocation4], %s514_s14, %s514_s14, %s515_s15   ;;  %v254_v38 = vadd.f32 %v316_v35, %v253_v37 }
 0x107   :  { %s462_s6 = scalar_lea.vmem %s280_s13, 256  ;;  %p467_p12 = scmp.lt.s32.totalorder %s280_s13, %s280_s13 }
 0x108   :  { %p463_p11 = scmp.ne.s32.totalorder %s280_s13, %s462_s6  ;;  %p468_p13 = scmp.lt.s32.totalorder %s462_s6, %s462_s6 }
 0x10a   :  { %p469_p0 = por %p468_p13, %p467_p12 }
 0x10c   :  { %p470_p1 = pnand %p469_p0, %p463_p11 }
 0x10e   :  { %473 = shalt.err (!%p470_p1)
}
 0x10f   :  { %285 = dma.vmem_to_hbm [thread:$0]  %s280_s13, 256, %s644_s8, [#allocation12], %s514_s14, %s514_s14, %s515_s15   ;;  %v349_v39 = vpop.f32.mrf.mxu0  ;;  %260 = vst.msk [vmem:[#allocation13] sm:$0xff] %vm103_vm1, %v254_v38 }
 0x110   :  { %s522_s21 = smov [#allocation13]  }
 0x111   :  { %s291_s22 = sshll.u32 %s522_s21, 4  ;;  %v256_v40 = vpop.f32.mrf.mxu0  ;;  %s292_s22 = int_to_ptr.vmem [resolvable:$true] %s291_s22 }
 0x112   :  { %v257_v41 = vadd.f32 %v316_v35, %v256_v40  ;;  %s482_s7 = scalar_lea.vmem %s292_s22, 256  ;;  %p487_p3 = scmp.lt.s32.totalorder %s292_s22, %s292_s22 }
 0x113   :  { %v350_v42 = vpop.f32.mrf.mxu0  ;;  %p483_p2 = scmp.ne.s32.totalorder %s292_s22, %s482_s7  ;;  %p488_p4 = scmp.lt.s32.totalorder %s482_s7, %s482_s7 }
 0x114   :  { %261 = vst.msk [vmem:[#allocation13 + $0x8] sm:$0xff] %vm103_vm1, %v257_v41 }
 0x115   :  { %p489_p5 = por %p488_p4, %p487_p3 }
 0x117   :  { %p490_p6 = pnand %p489_p5, %p483_p2 }
 0x119   :  { %493 = shalt.err (!%p490_p6)
}
 0x11a   :  { %297 = dma.vmem_to_hbm [thread:$0]  %s292_s22, 256, %s645_s9, [#allocation12], %s514_s14, %s514_s14, %s515_s15  }
 0x11b   :  { %508 = dma.done.wait [#allocation4], 256  }
 0x11c   :  { %509 = vsyncadd [#allocation4], 4294967040 }
 0x11d   :  { %510 = dma.done.wait [#allocation12], 512  }
 0x11e   :  { %511 = vsyncadd [#allocation12], 4294966784 }
 0x11f   :  { %307 = vsyncpa [#allocation3], 1 }
 0x120   :  { %308 = vsyncpa [#allocation6], 1 }
 0x121   :  { %309 = vsyncpa [#allocation9], 1 }
 0x122   :  { %310 = vsyncpa [#allocation4], 1 }
 0x123   :  { %311 = vsyncpa [#allocation12], 1 }

</bundles_post_ra>
